<compile_context>
chip_gen: v6e
topology: v6e:2x2x1
jax: 0.10.0
libtpu: 0.0.40
codegen_flags: <defaults>
</compile_context>

<pallas_src>
import functools
import math

import jax
import jax.numpy as jnp
from jax import lax
from jax.experimental import pallas as pl
from jax.experimental.pallas import tpu as pltpu

TAU = 2.0
V_TH = 1.0
LANE = 128


def _round_up(x, m):
    return (x + m - 1) // m * m


def _pick_tile(total, cap, quantum):
    """Largest multiple of `quantum` that divides `total` and is <= cap."""
    t = max(quantum, min(cap, total))
    t = (t // quantum) * quantum
    while t > quantum and total % t != 0:
        t -= quantum
    return t


def _lif_step(v, x):
    """One LIF charge/fire/reset step (decay_input=True, v_reset=0). f32 in/out."""
    v = v + (x - v) * (1.0 / TAU)
    spiked = v >= V_TH                       # forward Heaviside (surrogate is bwd-only)
    s = jnp.where(spiked, 1.0, 0.0)
    v = jnp.where(spiked, 0.0, v)            # hard reset to 0
    return v, s


# ---------------------------------------------------------------------------
# Kernel 1: hoisted state-free layer-1 matmul   h1 = x @ w1
#   A blocks arrive as f32 and are cast to bf16 in-kernel; accumulate in f32;
#   final store in bf16.
# ---------------------------------------------------------------------------
def _matmul_kernel(a_ref, b_ref, o_ref, acc_ref):
    @pl.when(pl.program_id(1) == 0)
    def _():
        acc_ref[...] = jnp.zeros_like(acc_ref)

    acc_ref[...] += jnp.dot(a_ref[...].astype(jnp.bfloat16), b_ref[...],
                            preferred_element_type=jnp.float32)

    @pl.when(pl.program_id(1) == pl.num_programs(1) - 1)
    def _():
        o_ref[...] = acc_ref[...].astype(o_ref.dtype)


def _hoisted_linear(x2d, w_bf16, *, tm=512, tk=512):
    """x2d: [M, D] f32, w_bf16: [D, Hp] bf16 with Hp % 128 == 0.

    Returns h1 [M, Hp] bf16 (bf16 MXU inputs, f32 accumulation)."""
    M, D = x2d.shape
    Hp = w_bf16.shape[1]

    tm = min(tm, _round_up(M, 8))
    tk = min(tk, _round_up(D, LANE))
    Mp = _round_up(M, tm)
    Dp = _round_up(D, tk)

    # Only materialize padded copies when the tiles don't divide the arrays.
    a = x2d
    if (Mp, Dp) != (M, D):
        a = jnp.zeros((Mp, Dp), x2d.dtype).at[:M, :D].set(x2d)
    b = w_bf16
    if Dp != D:
        b = jnp.zeros((Dp, Hp), w_bf16.dtype).at[:D, :].set(w_bf16)

    cost = pl.CostEstimate(
        flops=2 * Mp * Dp * Hp,
        transcendentals=0,
        bytes_accessed=Mp * Dp * 4 + (Mp // tm) * Dp * Hp * 2 + Mp * Hp * 2,
    )
    out = pl.pallas_call(
        _matmul_kernel,
        out_shape=jax.ShapeDtypeStruct((Mp, Hp), jnp.bfloat16),
        grid_spec=pltpu.PrefetchScalarGridSpec(
            num_scalar_prefetch=0,
            grid=(Mp // tm, Dp // tk),
            in_specs=[
                pl.BlockSpec((tm, tk), lambda i, k: (i, k)),
                pl.BlockSpec((tk, Hp), lambda i, k: (k, 0)),
            ],
            out_specs=pl.BlockSpec((tm, Hp), lambda i, k: (i, 0)),
            scratch_shapes=[pltpu.VMEM((tm, Hp), jnp.float32)],
        ),
        compiler_params=pltpu.CompilerParams(
            dimension_semantics=("parallel", "arbitrary"),
        ),
        cost_estimate=cost,
    )(a, b)
    if Mp != M:
        out = out[:M]
    return out


# ---------------------------------------------------------------------------
# Kernel 2: stateful LIF recurrence over time (tt timesteps per grid step)
#   h1 arrives in bf16; membrane state is f32 in VMEM scratch; spikes stored
#   bf16 (exactly 0/1), lane-dense 128-wide.
# ---------------------------------------------------------------------------
def _snn_recurrent_kernel(h1_ref, w2_ref, w3_ref, o_ref,
                          v1_ref, v2_ref, v3_ref, *, tt):
    # Time axis (grid axis 1) is sequential; zero the membrane state at the
    # start of every batch block.
    @pl.when(pl.program_id(1) == 0)
    def _():
        v1_ref[...] = jnp.zeros_like(v1_ref)
        v2_ref[...] = jnp.zeros_like(v2_ref)
        v3_ref[...] = jnp.zeros_like(v3_ref)

    def body(i, carry):
        # Membrane state stays in VMEM scratch (load/store per timestep) and
        # weights are read from their refs inside the dots, so live vreg
        # ranges stay bounded even for tn=128 / long unrolls.
        v1, s1 = _lif_step(v1_ref[...], h1_ref[i].astype(jnp.float32))
        v1_ref[...] = v1
        v2, s2 = _lif_step(
            v2_ref[...],
            jnp.dot(s1, w2_ref[...], preferred_element_type=jnp.float32))
        v2_ref[...] = v2
        v3, s3 = _lif_step(
            v3_ref[...],
            jnp.dot(s2, w3_ref[...], preferred_element_type=jnp.float32))
        v3_ref[...] = v3
        o_ref[i] = s3.astype(o_ref.dtype)            # lane-dense 128-wide store
        return carry

    lax.fori_loop(0, tt, body, 0, unroll=True)


def _snn_recurrence(h1_seq, w2p, w3p, *, tt=16, tn=None):
    """h1_seq: [T, N, H1P] bf16 (H1P % 128 == 0). Returns spikes [T, N, OUTP] bf16."""
    T, N, H1P = h1_seq.shape
    H2P = w2p.shape[1]
    OUTP = w3p.shape[1]

    # Time tile: largest divisor of T <= tt so no padded copy of h1 is built.
    tt = _pick_tile(T, max(1, tt), 1)

    Np = _round_up(N, 8)
    if tn is None:
        tn = 128
    tn = _pick_tile(Np, tn, 8)
    # Keep >= 2 blocks on the batch-parallel axis when the batch allows it,
    # so both TensorCores get work on megacore parts (v7x).
    if Np // tn < 2 and Np >= 16:
        tn = _pick_tile(Np, Np // 2, 8)

    h = h1_seq
    if Np != N:
        h = jnp.zeros((T, Np, H1P), h1_seq.dtype).at[:, :N].set(h1_seq)

    cost = pl.CostEstimate(
        flops=2 * T * Np * (H1P * H2P + H2P * OUTP)
        + 8 * T * Np * (H1P + H2P + OUTP),
        transcendentals=0,
        bytes_accessed=T * Np * H1P * 2 + H1P * H2P * 4 + H2P * OUTP * 4
        + T * Np * OUTP * 2,
    )
    out = pl.pallas_call(
        functools.partial(_snn_recurrent_kernel, tt=tt),
        out_shape=jax.ShapeDtypeStruct((T, Np, OUTP), jnp.bfloat16),
        grid_spec=pltpu.PrefetchScalarGridSpec(
            num_scalar_prefetch=0,
            grid=(Np // tn, T // tt),             # (batch-parallel, time-sequential)
            in_specs=[
                pl.BlockSpec((tt, tn, H1P), lambda nb, tb: (tb, nb, 0)),
                pl.BlockSpec((H1P, H2P), lambda nb, tb: (0, 0)),
                pl.BlockSpec((H2P, OUTP), lambda nb, tb: (0, 0)),
            ],
            out_specs=pl.BlockSpec((tt, tn, OUTP), lambda nb, tb: (tb, nb, 0)),
            scratch_shapes=[
                pltpu.VMEM((tn, H1P), jnp.float32),   # membrane potentials (f32)
                pltpu.VMEM((tn, H2P), jnp.float32),
                pltpu.VMEM((tn, OUTP), jnp.float32),
            ],
        ),
        compiler_params=pltpu.CompilerParams(
            dimension_semantics=("parallel", "arbitrary"),
        ),
        cost_estimate=cost,
    )(h, w2p, w3p)
    if Np != N:
        out = out[:, :N]
    return out


# ---------------------------------------------------------------------------
# Full forward pass
# ---------------------------------------------------------------------------
def snn_forward(x_seq, w1, w2, w3, *, tt=16):
    """x_seq: [T, N, ...spatial] ; w*: [in, out] f32.  Returns spikes [T, N, out] f32."""
    T, N = x_seq.shape[0], x_seq.shape[1]
    D = math.prod(x_seq.shape[2:])
    x2d = x_seq.reshape(T * N, D).astype(jnp.float32)  # layer.Flatten, step_mode='m'

    H1, H2, OUT = w1.shape[1], w2.shape[1], w3.shape[1]
    H1P = _round_up(H1, LANE)
    H2P = _round_up(H2, LANE)
    OUTP = _round_up(OUT, LANE)

    # Zero-pad hidden/output widths to 128 lanes (padded neurons never spike,
    # padded weight rows are zero, so results are exactly unchanged).
    w1p = jnp.zeros((D, H1P), jnp.bfloat16).at[:, :H1].set(w1.astype(jnp.bfloat16))
    w2p = jnp.zeros((H1P, H2P), jnp.float32).at[:H1, :H2].set(w2.astype(jnp.float32))
    w3p = jnp.zeros((H2P, OUTP), jnp.float32).at[:H2, :OUT].set(w3.astype(jnp.float32))

    h1 = _hoisted_linear(x2d, w1p)                      # [T*N, H1P] bf16
    h1 = h1.reshape(T, N, H1P)                          # free (contiguous)
    spikes = _snn_recurrence(h1, w2p, w3p, tt=tt)       # [T, N, OUTP] bf16 (0/1 exact)
    return spikes[:, :, :OUT].astype(jnp.float32)


# ---------------------------------------------------------------------------
# Pure-JAX reference (same precision choices: bf16 layer-1 inputs, f32 accum,
# bf16 h1 hand-off; spikes are exact 0/1 so downstream layers are unaffected).
# ---------------------------------------------------------------------------
def snn_reference(x_seq, w1, w2, w3):
    T, N = x_seq.shape[0], x_seq.shape[1]
    D = w1.shape[0]
    x2d = x_seq.reshape(T * N, D)
    h1 = jnp.dot(x2d.astype(jnp.bfloat16), w1.astype(jnp.bfloat16),
                 preferred_element_type=jnp.float32)
    h1_seq = h1.astype(jnp.bfloat16).astype(jnp.float32).reshape(T, N, -1)

    def step(carry, h):
        v1, v2, v3 = carry
        v1, s1 = _lif_step(v1, h)
        v2, s2 = _lif_step(v2, jnp.dot(s1, w2, preferred_element_type=jnp.float32,
                                       precision=lax.Precision.HIGHEST))
        v3, s3 = _lif_step(v3, jnp.dot(s2, w3, preferred_element_type=jnp.float32,
                                       precision=lax.Precision.HIGHEST))
        return (v1, v2, v3), s3

    init = (
        jnp.zeros((N, w1.shape[1]), jnp.float32),
        jnp.zeros((N, w2.shape[1]), jnp.float32),
        jnp.zeros((N, w3.shape[1]), jnp.float32),
    )
    _, out = lax.scan(step, init, h1_seq)
    return out


if __name__ == "__main__":
    # Small shapes consistent with the module's structure:
    #   image_size (150*400 in the original) -> H*W = 8*16 = 128 here
    #   neurons=32, neurons2=16, output=2, T=16 timesteps, batch N=8
    T, N, H, W = 16, 8, 8, 16
    D = H * W
    NEURONS, NEURONS2, OUT = 32, 16, 2

    key = jax.random.PRNGKey(0)
    kx, k1, k2, k3 = jax.random.split(key, 4)

    # PyTorch Linear-style uniform init (deterministic).
    w1 = jax.random.uniform(k1, (D, NEURONS), jnp.float32,
                            -1.0 / jnp.sqrt(D), 1.0 / jnp.sqrt(D))
    w2 = jax.random.uniform(k2, (NEURONS, NEURONS2), jnp.float32,
                            -1.0 / jnp.sqrt(NEURONS), 1.0 / jnp.sqrt(NEURONS))
    w3 = jax.random.uniform(k3, (NEURONS2, OUT), jnp.float32,
                            -1.0 / jnp.sqrt(NEURONS2), 1.0 / jnp.sqrt(NEURONS2))

    # Input sequence [T, N, H, W]; scaled so spikes actually occur.
    x = jax.random.normal(kx, (T, N, H, W), jnp.float32) * 2.0

    out = snn_forward(x, w1, w2, w3, tt=16)
    out = jax.block_until_ready(out)

    ref = snn_reference(x, w1, w2, w3)
    assert out.shape == (T, N, OUT), out.shape
    assert jnp.allclose(out, ref, atol=1e-5), (out, ref)

    print("KERNEL_OK")
</pallas_src>

<mosaic_0001>
module attributes {stable_mosaic.version = 11 : i64} {
  func.func @_matmul_kernel(%arg0: i32, %arg1: i32, %arg2: memref<128x128xf32, #tpu.memory_space<vmem>>, %arg3: memref<128x128xbf16, #tpu.memory_space<vmem>>, %arg4: memref<128x128xbf16, #tpu.memory_space<vmem>>, %arg5: memref<128x128xf32, #tpu.memory_space<vmem>>) attributes {dimension_semantics = [#tpu.dimension_semantics<parallel>, #tpu.dimension_semantics<arbitrary>], iteration_bounds = array<i64: 1, 1>, scalar_prefetch = 0 : i64, scratch_operands = 1 : i64, tpu.core_type = #tpu.core_type<tc>, window_params = [{transform_indices = @transform_0, window_bounds = array<i64: 128, 128>}, {transform_indices = @transform_1, window_bounds = array<i64: 128, 128>}, {transform_indices = @transform_2, window_bounds = array<i64: 128, 128>}]} {
    %c0_i32 = arith.constant 0 : i32
    %0 = arith.cmpi eq, %arg1, %c0_i32 : i32
    %1 = arith.extui %0 : i1 to i32
    %c0_i32_0 = arith.constant 0 : i32
    %2 = arith.cmpi ne, %1, %c0_i32_0 : i32
    scf.if %2 {
      %cst_10 = arith.constant 0.000000e+00 : f32
      %13 = vector.broadcast %cst_10 : f32 to vector<128x128xf32>
      %c0_11 = arith.constant 0 : index
      %c0_12 = arith.constant 0 : index
      %14 = vector.load %arg5[%c0_11, %c0_12] : memref<128x128xf32, #tpu.memory_space<vmem>>, vector<128x128xf32>
      tpu.vector_store %arg5[%c0_11, %c0_12], %13 {strides = array<i32>} : memref<128x128xf32, #tpu.memory_space<vmem>>, vector<128x128xf32>,
    } else {
    }
    %c0 = arith.constant 0 : index
    %c0_1 = arith.constant 0 : index
    %3 = vector.load %arg5[%c0, %c0_1] : memref<128x128xf32, #tpu.memory_space<vmem>>, vector<128x128xf32>
    %c0_2 = arith.constant 0 : index
    %c0_3 = arith.constant 0 : index
    %4 = vector.load %arg2[%c0_2, %c0_3] : memref<128x128xf32, #tpu.memory_space<vmem>>, vector<128x128xf32>
    %5 = arith.truncf %4 : vector<128x128xf32> to vector<128x128xbf16>
    %c0_4 = arith.constant 0 : index
    %c0_5 = arith.constant 0 : index
    %6 = vector.load %arg3[%c0_4, %c0_5] : memref<128x128xbf16, #tpu.memory_space<vmem>>, vector<128x128xbf16>
    %cst = arith.constant dense<0.000000e+00> : vector<128x128xf32>
    %7 = tpu.matmul %5, %6, %cst {dimension_numbers = #tpu.dot_dimension_numbers<[1], [0], [0], [1], [0, 0, 1, 1], [], []>} : vector<128x128xbf16>, vector<128x128xbf16>, vector<128x128xf32> -> vector<128x128xf32>
    %8 = arith.addf %3, %7 : vector<128x128xf32>
    %c0_6 = arith.constant 0 : index
    %c0_7 = arith.constant 0 : index
    %9 = vector.load %arg5[%c0_6, %c0_7] : memref<128x128xf32, #tpu.memory_space<vmem>>, vector<128x128xf32>
    tpu.vector_store %arg5[%c0_6, %c0_7], %8 {strides = array<i32>} : memref<128x128xf32, #tpu.memory_space<vmem>>, vector<128x128xf32>,
    %c0_i32_8 = arith.constant 0 : i32
    %10 = arith.cmpi eq, %arg1, %c0_i32_8 : i32
    %11 = arith.extui %10 : i1 to i32
    %c0_i32_9 = arith.constant 0 : i32
    %12 = arith.cmpi ne, %11, %c0_i32_9 : i32
    scf.if %12 {
      %c0_10 = arith.constant 0 : index
      %c0_11 = arith.constant 0 : index
      %13 = vector.load %arg5[%c0_10, %c0_11] : memref<128x128xf32, #tpu.memory_space<vmem>>, vector<128x128xf32>
      %14 = arith.truncf %13 : vector<128x128xf32> to vector<128x128xbf16>
      %c0_12 = arith.constant 0 : index
      %c0_13 = arith.constant 0 : index
      %15 = vector.load %arg4[%c0_12, %c0_13] : memref<128x128xbf16, #tpu.memory_space<vmem>>, vector<128x128xbf16>
      tpu.vector_store %arg4[%c0_12, %c0_13], %14 {strides = array<i32>} : memref<128x128xbf16, #tpu.memory_space<vmem>>, vector<128x128xbf16>,
    } else {
    }
    return
  }
  func.func @transform_0(%arg0: i32, %arg1: i32) -> (i32, i32) {
    %c0_i32 = arith.constant 0 : i32
    return %arg0, %arg1 : i32, i32
  }
  func.func @transform_1(%arg0: i32, %arg1: i32) -> (i32, i32) {
    %c0_i32 = arith.constant 0 : i32
    %c0_i32_0 = arith.constant 0 : i32
    return %arg1, %c0_i32 : i32, i32
  }
  func.func @transform_2(%arg0: i32, %arg1: i32) -> (i32, i32) {
    %c0_i32 = arith.constant 0 : i32
    %c0_i32_0 = arith.constant 0 : i32
    return %arg0, %c0_i32 : i32, i32
  }
}

</mosaic_0001>

<bundles_post_ra>
// kernel: tpu_custom_call.1
= control target key start
LH: loop header
LB: loop body
LE: loop exit
PB: predicated region body
PF: predicated region fallthrough
CT: control target
= control target key end

     0   :  { %7 = vsyncpa [#allocation4], 0  ;;  %s680_s0 = inlined_call_operand.hbm [shape: f32[128,128], index: 0, kind: input, shape index: {}]   ;;  %s681_s1 = inlined_call_operand.hbm [shape: bf16[128,128], index: 1, kind: input, shape index: {}]   ;;  %s682_s2 = inlined_call_operand.hbm [shape: bf16[128,128], index: 2, kind: output, shape index: {}]  }
   0x1   :  { %8 = vsyncpa [#allocation7], 0 }
   0x2   :  { %9 = vsyncpa [#allocation5], 0  ;;  %s643_s9 = smov [#allocation3]  }
   0x3   :  { %s15_s10 = sshll.u32 %s643_s9, 4  ;;  %s16_s10 = int_to_ptr.vmem [resolvable:$true] %s15_s10 }
   0x4   :  { %s585_s11 = scalar_lea.vmem %s16_s10, 2048  ;;  %p590_p1 = scmp.lt.s32.totalorder %s16_s10, %s16_s10 }
   0x5   :  { %p586_p0 = scmp.ne.s32.totalorder %s16_s10, %s585_s11  ;;  %p591_p2 = scmp.lt.s32.totalorder %s585_s11, %s585_s11 }
   0x7   :  { %p592_p3 = por %p591_p2, %p590_p1 }
   0x9   :  { %p593_p4 = pnand %p592_p3, %p586_p0 }
   0xb   :  { %596 = shalt.err (!%p593_p4)
}
   0xc   :  { %s644_s12 = smov 128   ;;  %s645_s13 = smov 8  }
   0xd   :  { %21 = dma.hbm_to_vmem [thread:$0]  %s680_s0, 2048, %s16_s10, [#allocation4], %s644_s12, %s644_s12, %s645_s13  }
   0xe   :  { %s646_s16 = smov [#allocation6]  }
   0xf   :  { %s27_s17 = sshll.u32 %s646_s16, 4  ;;  %s28_s17 = int_to_ptr.vmem [resolvable:$true] %s27_s17 }
  0x10   :  { %s605_s18 = scalar_lea.vmem %s28_s17, 1024  ;;  %p610_p6 = scmp.lt.s32.totalorder %s28_s17, %s28_s17 }
  0x11   :  { %p606_p5 = scmp.ne.s32.totalorder %s28_s17, %s605_s18  ;;  %p611_p7 = scmp.lt.s32.totalorder %s605_s18, %s605_s18 }
  0x13   :  { %p612_p8 = por %p611_p7, %p610_p6 }
  0x15   :  { %p613_p9 = pnand %p612_p8, %p606_p5 }
  0x17   :  { %616 = shalt.err (!%p613_p9)
}
  0x18   :  { %s647_s19 = smov 64   ;;  %s648_s20 = smov 4  }
  0x19   :  { %33 = dma.hbm_to_vmem [thread:$0]  %s681_s1, 1024, %s28_s17, [#allocation7], %s647_s19, %s647_s19, %s648_s20  }
  0x1a   :  { %637 = dma.done.wait [#allocation4], 2048  }
  0x1b   :  { %638 = vsyncadd [#allocation4], 4294965248 }
  0x1c   :  { %639 = dma.done.wait [#allocation7], 1024  }
  0x1d   :  { %640 = vsyncadd [#allocation7], 4294966272  ;;  %v569_v0 = vld [vmem:[#allocation6 + $0x38] sm:$0xff]   ;;  %v570_v1 = vld [vmem:[#allocation6 + $0x30] sm:$0xff]   ;;  %s649_s0 = smov [#allocation8]  }
  0x1e   :  { %514 = vmatprep.subr.bf16.mxu0 %v569_v0  ;;  %546 = vmatprep.subr.bf16.mxu1 %v569_v0  ;;  %v571_v2 = vld [vmem:[#allocation6 + $0x28] sm:$0xff]   ;;  %v572_v3 = vld [vmem:[#allocation6 + $0x20] sm:$0xff]   ;;  %v573_v10 = vld [vmem:[#allocation6 + $0x18] sm:$0xff]   ;;  %s398_s1 = sshll.u32 %s649_s0, 4  ;;  %s399_s1 = int_to_ptr.vmem [resolvable:$true] %s398_s1 }
  0x1f   :  { %515 = vmatpush3.bf16.msra.mxu0 %v569_v0  ;;  %554 = vmatpush3.bf16.msra.mxu1 %v569_v0  ;;  %v77_v4 = vld [vmem:[#allocation3] sm:$0xff]  ;;  %v78_v5 = vld [vmem:[#allocation3 + $0x8] sm:$0xff]  ;;  %v574_v11 = vld [vmem:[#allocation6 + $0x10] sm:$0xff]   ;;  %s617_s23 = scalar_lea.vmem %s399_s1, 1024  ;;  %p622_p11 = scmp.lt.s32.totalorder %s399_s1, %s399_s1 }
  0x20   :  { %516 = vmatprep.subr.bf16.mxu0 %v570_v1  ;;  %547 = vmatprep.subr.bf16.mxu1 %v570_v1  ;;  %v85_v6 = vld [vmem:[#allocation3 + $0x40] sm:$0xff]  ;;  %v93_v7 = vpack.c.bf16 %v78_v5, %v77_v4  ;;  %v86_v8 = vld [vmem:[#allocation3 + $0x48] sm:$0xff]  ;;  %v79_v14 = vld [vmem:[#allocation3 + $0x10] sm:$0xff]  ;;  %p618_p10 = scmp.ne.s32.totalorder %s399_s1, %s617_s23  ;;  %p623_p12 = scmp.lt.s32.totalorder %s617_s23, %s617_s23 }
  0x21   :  { %v97_v9 = vpack.c.bf16 %v86_v8, %v85_v6  ;;  %v575_v12 = vld [vmem:[#allocation6 + $0x8] sm:$0xff]   ;;  %v576_v13 = vld [vmem:[#allocation6] sm:$0xff]   ;;  %v80_v15 = vld [vmem:[#allocation3 + $0x18] sm:$0xff] }
  0x22   :  { %530 = vmatprep.mubr.bf16.mxu0 %v93_v7  ;;  %v87_v16 = vld [vmem:[#allocation3 + $0x50] sm:$0xff]  ;;  %v88_v17 = vld [vmem:[#allocation3 + $0x58] sm:$0xff]  ;;  %v81_v18 = vld [vmem:[#allocation3 + $0x20] sm:$0xff]  ;;  %v94_v22 = vpack.c.bf16 %v80_v15, %v79_v14  ;;  %p624_p13 = por %p623_p12, %p622_p11 }
  0x23   :  { %517 = vmatpush3.bf16.msra.mxu0 %v570_v1  ;;  %555 = vmatpush3.bf16.msra.mxu1 %v570_v1  ;;  %v82_v19 = vld [vmem:[#allocation3 + $0x28] sm:$0xff]  ;;  %v89_v20 = vld [vmem:[#allocation3 + $0x60] sm:$0xff]  ;;  %v98_v23 = vpack.c.bf16 %v88_v17, %v87_v16  ;;  %v83_v26 = vld [vmem:[#allocation3 + $0x30] sm:$0xff] }
  0x24   :  { %518 = vmatprep.subr.bf16.mxu0 %v571_v2  ;;  %548 = vmatprep.subr.bf16.mxu1 %v571_v2  ;;  %v90_v21 = vld [vmem:[#allocation3 + $0x68] sm:$0xff]  ;;  %v95_v24 = vpack.c.bf16 %v82_v19, %v81_v18  ;;  %v84_v27 = vld [vmem:[#allocation3 + $0x38] sm:$0xff]  ;;  %v91_v28 = vld [vmem:[#allocation3 + $0x70] sm:$0xff]  ;;  %p625_p0 = pnand %p624_p13, %p618_p10 }
  0x25   :  { %538 = vmatprep.mubr.bf16.mxu1 %v97_v9  ;;  %v99_v25 = vpack.c.bf16 %v90_v21, %v89_v20  ;;  %v92_v29 = vld [vmem:[#allocation3 + $0x78] sm:$0xff]  ;;  %v96_v30 = vpack.c.bf16 %v84_v27, %v83_v26 }
  0x26   :  { %v100_v31 = vpack.c.bf16 %v92_v29, %v91_v28 }
  0x27   :  { %519 = vmatpush3.bf16.msra.mxu0 %v571_v2  ;;  %556 = vmatpush3.bf16.msra.mxu1 %v571_v2 }
  0x28   :  { %520 = vmatprep.subr.bf16.mxu0 %v572_v3  ;;  %549 = vmatprep.subr.bf16.mxu1 %v572_v3 }
  0x2b   :  { %521 = vmatpush3.bf16.msra.mxu0 %v572_v3  ;;  %557 = vmatpush3.bf16.msra.mxu1 %v572_v3 }
  0x2c   :  { %522 = vmatprep.subr.bf16.mxu0 %v573_v10  ;;  %550 = vmatprep.subr.bf16.mxu1 %v573_v10 }
  0x2f   :  { %523 = vmatpush3.bf16.msra.mxu0 %v573_v10  ;;  %558 = vmatpush3.bf16.msra.mxu1 %v573_v10 }
  0x30   :  { %524 = vmatprep.subr.bf16.mxu0 %v574_v11  ;;  %551 = vmatprep.subr.bf16.mxu1 %v574_v11 }
  0x33   :  { %525 = vmatpush3.bf16.msra.mxu0 %v574_v11  ;;  %559 = vmatpush3.bf16.msra.mxu1 %v574_v11 }
  0x34   :  { %526 = vmatprep.subr.bf16.mxu0 %v575_v12  ;;  %552 = vmatprep.subr.bf16.mxu1 %v575_v12 }
  0x37   :  { %527 = vmatpush3.bf16.msra.mxu0 %v575_v12  ;;  %560 = vmatpush3.bf16.msra.mxu1 %v575_v12 }
  0x38   :  { %528 = vmatprep.subr.bf16.mxu0 %v576_v13  ;;  %553 = vmatprep.subr.bf16.mxu1 %v576_v13 }
  0x3b   :  { %529 = vmatpush3.bf16.msra.mxu0 %v576_v13  ;;  %561 = vmatpush3.bf16.msra.mxu1 %v576_v13 }
  0x3e   :  { %531 = vmatmul.mubr.bf16.vlgmr.msra.gmra.mxu0 %v94_v22  ;;  %539 = vmatmul.mubr.bf16.vlgmr.msra.gmra.mxu1 %v98_v23 }
  0x3f   :  { %534 = vmatprep.mubr.bf16.mxu0 %v95_v24  ;;  %542 = vmatprep.mubr.bf16.mxu1 %v99_v25 }
  0x46   :  { %535 = vmatmul.mubr.bf16.gmra.mxu0 %v96_v30  ;;  %543 = vmatmul.mubr.bf16.gmra.mxu1 %v100_v31 }
  0xfe   :  { %v532_v32 = vpop.f32.mrf.mxu0  ;;  %v540_v33 = vpop.f32.mrf.mxu1 }
 0x100   :  { %v199_v34 = vpop.f32.mrf.mxu0  ;;  %v231_v35 = vpop.f32.mrf.mxu1 }
 0x102   :  { %v533_v36 = vpop.f32.mrf.mxu0  ;;  %v541_v37 = vpop.f32.mrf.mxu1 }
 0x103   :  { %v459_v38 = vpack.c.bf16 %v533_v36, %v532_v32  ;;  %v479_v39 = vpack.c.bf16 %v541_v37, %v540_v33 }
 0x104   :  { %v202_v40 = vpop.f32.mrf.mxu0  ;;  %v234_v41 = vpop.f32.mrf.mxu1 }
 0x105   :  { %491 = vst [vmem:[#allocation8 + $0x8] sm:$0xff] %v459_v38   ;;  %495 = vst [vmem:[#allocation8 + $0x28] sm:$0xff] %v479_v39   ;;  %v454_v42 = vpack.c.bf16 %v202_v40, %v199_v34  ;;  %v474_v43 = vpack.c.bf16 %v234_v41, %v231_v35 }
 0x106   :  { %v536_v44 = vpop.f32.mrf.mxu0  ;;  %v544_v45 = vpop.f32.mrf.mxu1 }
 0x107   :  { %455 = vst [vmem:[#allocation8] sm:$0xff] %v454_v42   ;;  %494 = vst [vmem:[#allocation8 + $0x20] sm:$0xff] %v474_v43  }
 0x108   :  { %v215_v46 = vpop.f32.mrf.mxu0  ;;  %v247_v47 = vpop.f32.mrf.mxu1 }
 0x10a   :  { %v537_v48 = vpop.f32.mrf.mxu0  ;;  %v545_v49 = vpop.f32.mrf.mxu1 }
 0x10b   :  { %v469_v50 = vpack.c.bf16 %v537_v48, %v536_v44  ;;  %v489_v51 = vpack.c.bf16 %v545_v49, %v544_v45 }
 0x10c   :  { %v218_v52 = vpop.f32.mrf.mxu0  ;;  %v250_v53 = vpop.f32.mrf.mxu1 }
 0x10d   :  { %493 = vst [vmem:[#allocation8 + $0x18] sm:$0xff] %v469_v50   ;;  %497 = vst [vmem:[#allocation8 + $0x38] sm:$0xff] %v489_v51   ;;  %v464_v54 = vpack.c.bf16 %v218_v52, %v215_v46  ;;  %v484_v55 = vpack.c.bf16 %v250_v53, %v247_v47 }
 0x10f   :  { %492 = vst [vmem:[#allocation8 + $0x10] sm:$0xff] %v464_v54   ;;  %496 = vst [vmem:[#allocation8 + $0x30] sm:$0xff] %v484_v55  }
 0x110   :  { %628 = shalt.err (!%p625_p0)
}
 0x111   :  { %404 = dma.vmem_to_hbm [thread:$0]  %s399_s1, 1024, %s682_s2, [#allocation5], %s647_s19, %s647_s19, %s648_s20  }
 0x112   :  { %641 = dma.done.wait [#allocation5], 1024  }
 0x113   :  { %642 = vsyncadd [#allocation5], 4294966272 }
 0x114   :  { %408 = vsyncpa [#allocation4], 1 }
 0x115   :  { %409 = vsyncpa [#allocation7], 1 }
 0x116   :  { %410 = vsyncpa [#allocation5], 1 }

</bundles_post_ra>
